<compile_context>
chip_gen: v7x
topology: tpu7x:2x2x1
jax: 0.10.0
libtpu: 0.0.40
codegen_flags: <defaults>
</compile_context>

<pallas_src>
import functools

import jax
import jax.numpy as jnp
from jax.experimental import pallas as pl
from jax.experimental.pallas import tpu as pltpu

NEG_SLOPE = 0.01  # PyTorch nn.LeakyReLU default negative_slope


def _leaky_relu(v):
    return jnp.where(v >= 0, v, NEG_SLOPE * v)


def _basic_block_kernel(x_ref, p1_ref, p2_ref, o_ref, pad_ref, *, H, W, C):
    """Fused BasicBlock for one image.

    x_ref   : (1, H, W*C)        input slab (channels-last, W*C on lanes)
    p*_ref  : (KP, W*C)          packed conv params: 3 banded ((W+2)*C, W*C)
                                 ky-matrices stacked + 1 bias row (+ zero pad rows)
    o_ref   : (1, H, W*C)        output slab
    pad_ref : (H+2, (W+2)*C)     VMEM scratch holding the zero-padded activation
    """
    WC = W * C
    WCp = (W + 2) * C

    def conv3x3(params_ref):
        # Bias (lane l = w*C + c -> b[c]) is folded into the packed params.
        bias = params_ref[3 * WCp:3 * WCp + 1, :]                    # (1, WC)
        acc = jnp.broadcast_to(bias.astype(jnp.float32), (H, WC))
        for ky in range(3):
            patch = pad_ref[ky:ky + H, :]                            # (H, WCp) row slice
            band = params_ref[ky * WCp:(ky + 1) * WCp, :]            # (WCp, WC)
            acc = acc + jnp.dot(patch, band,
                                preferred_element_type=jnp.float32)
        return acc

    # --- stage 0: build zero-padded input in VMEM scratch (SAME padding) -----
    pad_ref[...] = jnp.zeros_like(pad_ref)
    pad_ref[1:1 + H, C:C + WC] = x_ref[0].astype(jnp.float32)

    # --- stage 1: conv1 + bias1 + LeakyReLU, kept resident in VMEM -----------
    out1 = _leaky_relu(conv3x3(p1_ref))
    pad_ref[1:1 + H, C:C + WC] = out1            # halo stays zero

    # --- stage 2: conv2 + bias2 + residual + LeakyReLU ------------------------
    out2 = conv3x3(p2_ref) + x_ref[0].astype(jnp.float32)   # x still in VMEM
    o_ref[0] = _leaky_relu(out2).astype(o_ref.dtype)


def _pack_conv_params(w_hwio, b, W):
    """(3,3,C,C) HWIO weights + (C,) bias -> (KP, W*C) packed operand.

    For each ky, a banded matrix B_ky of shape ((W+2)*C, W*C) with
        B_ky[(w+kx)*C + ci, w*C + co] = w[ky, kx, ci, co]
    so that   pad_row(y+ky) @ B_ky   applies all three kx taps of row ky to
    every output pixel at once.  Row 3*(W+2)*C holds the bias tiled over W.
    Rows are zero-padded to a multiple of 8 (sublane alignment).
    """
    _, _, Cin, Cout = w_hwio.shape
    assert Cin == Cout, "BasicBlock with no downsample requires Cin == Cout"
    C = Cin
    WC = W * C
    WCp = (W + 2) * C
    eye = jnp.eye(W, dtype=jnp.float32)

    def band(ky):
        acc = jnp.zeros((WCp, WC), jnp.float32)
        for kx in range(3):
            blk = jnp.kron(eye, w_hwio[ky, kx].astype(jnp.float32))      # (WC, WC)
            acc = acc + jnp.pad(blk, ((kx * C, (2 - kx) * C), (0, 0)))   # (WCp, WC)
        return acc

    bias_row = jnp.tile(b.astype(jnp.float32), W)[None, :]               # (1, WC)
    packed = jnp.concatenate([band(0), band(1), band(2), bias_row], axis=0)
    pad_rows = (-packed.shape[0]) % 8
    if pad_rows:
        packed = jnp.concatenate(
            [packed, jnp.zeros((pad_rows, WC), jnp.float32)], axis=0)
    return packed


def basic_block_forward(x_nchw, w1, b1, w2, b2):
    """BasicBlock forward. x_nchw: (N, C, H, W); weights HWIO; returns NCHW."""
    N, C, H, W = x_nchw.shape
    WC = W * C

    # NCHW -> lane-dense (N, H, W*C) channels-last slab.
    x_slab = jnp.transpose(x_nchw, (0, 2, 3, 1)).reshape(N, H, WC)

    p1 = _pack_conv_params(w1, b1, W)
    p2 = _pack_conv_params(w2, b2, W)
    KP = p1.shape[0]

    kernel = functools.partial(_basic_block_kernel, H=H, W=W, C=C)

    out_slab = pl.pallas_call(
        kernel,
        out_shape=jax.ShapeDtypeStruct((N, H, WC), x_slab.dtype),
        grid=(N,),
        in_specs=[
            pl.BlockSpec((1, H, WC), lambda n: (n, 0, 0)),
            pl.BlockSpec((KP, WC), lambda n: (0, 0)),   # constant block: fetched once
            pl.BlockSpec((KP, WC), lambda n: (0, 0)),
        ],
        out_specs=pl.BlockSpec((1, H, WC), lambda n: (n, 0, 0)),
        scratch_shapes=[pltpu.VMEM((H + 2, (W + 2) * C), jnp.float32)],
        compiler_params=pltpu.CompilerParams(
            dimension_semantics=("parallel",),
            vmem_limit_bytes=32 * 1024 * 1024,
        ),
    )(x_slab, p1, p2)

    # TODO(synk): for large H/W/C, add an H-tiled grid axis with a 1-row halo so the
    # double-buffered working set stays under v7x's 64 MiB VMEM.

    return jnp.transpose(out_slab.reshape(N, H, W, C), (0, 3, 1, 2))


def _reference_forward(x_nchw, w1, b1, w2, b2):
    """Pure-JAX reference using lax.conv (for a correctness check)."""
    dn = ("NHWC", "HWIO", "NHWC")
    x = jnp.transpose(x_nchw, (0, 2, 3, 1))

    def conv(inp, w, b):
        y = jax.lax.conv_general_dilated(
            inp, w, window_strides=(1, 1), padding="SAME",
            dimension_numbers=dn)
        return y + b.reshape(1, 1, 1, -1)

    out = _leaky_relu(conv(x, w1, b1))
    out = conv(out, w2, b2) + x
    out = _leaky_relu(out)
    return jnp.transpose(out, (0, 3, 1, 2))


if __name__ == "__main__":
    # Shapes consistent with BasicBlock(in_channels=4, out_channels=4, dims=2,
    # stride=1, use_norm=False, activation='LeakyReLU').
    N, C, H, W = 2, 4, 16, 16

    key = jax.random.PRNGKey(0)
    kx, kw1, kb1, kw2, kb2 = jax.random.split(key, 5)

    x = jax.random.normal(kx, (N, C, H, W), jnp.float32)
    scale = (2.0 / (9 * C)) ** 0.5
    w1 = scale * jax.random.normal(kw1, (3, 3, C, C), jnp.float32)
    b1 = 0.1 * jax.random.normal(kb1, (C,), jnp.float32)
    w2 = scale * jax.random.normal(kw2, (3, 3, C, C), jnp.float32)
    b2 = 0.1 * jax.random.normal(kb2, (C,), jnp.float32)

    out = jax.block_until_ready(basic_block_forward(x, w1, b1, w2, b2))
    assert out.shape == (N, C, H, W), out.shape

    ref = jax.block_until_ready(_reference_forward(x, w1, b1, w2, b2))
    max_err = float(jnp.max(jnp.abs(out - ref)))
    assert jnp.allclose(out, ref, atol=1e-4, rtol=1e-4), max_err

    print("KERNEL_OK")
</pallas_src>

<mosaic_0001>
module attributes {stable_mosaic.version = 11 : i64} {
  func.func @_basic_block_kernel(%arg0: i32, %arg1: memref<1x16x64xf32, #tpu.memory_space<vmem>>, %arg2: memref<224x64xf32, #tpu.memory_space<vmem>>, %arg3: memref<224x64xf32, #tpu.memory_space<vmem>>, %arg4: memref<1x16x64xf32, #tpu.memory_space<vmem>>, %arg5: memref<18x72xf32, #tpu.memory_space<vmem>>) attributes {dimension_semantics = [#tpu.dimension_semantics<parallel>], iteration_bounds = array<i64: 2>, scalar_prefetch = 0 : i64, scratch_operands = 1 : i64, tpu.core_type = #tpu.core_type<tc>, window_params = [{transform_indices = @transform_0, window_bounds = array<i64: 1, 16, 64>}, {pipeline_mode = #tpu.pipeline_mode<synchronous>, transform_indices = @transform_1, window_bounds = array<i64: 224, 64>}, {pipeline_mode = #tpu.pipeline_mode<synchronous>, transform_indices = @transform_2, window_bounds = array<i64: 224, 64>}, {transform_indices = @transform_3, window_bounds = array<i64: 1, 16, 64>}]} {
    %cst = arith.constant 0.000000e+00 : f32
    %0 = vector.broadcast %cst : f32 to vector<18x72xf32>
    %c0 = arith.constant 0 : index
    %c0_0 = arith.constant 0 : index
    %1 = vector.load %arg5[%c0, %c0_0] : memref<18x72xf32, #tpu.memory_space<vmem>>, vector<18x72xf32>
    tpu.vector_store %arg5[%c0, %c0_0], %0 {strides = array<i32>} : memref<18x72xf32, #tpu.memory_space<vmem>>, vector<18x72xf32>,
    %c0_1 = arith.constant 0 : index
    %c0_2 = arith.constant 0 : index
    %c0_3 = arith.constant 0 : index
    %2 = vector.load %arg1[%c0_1, %c0_2, %c0_3] : memref<1x16x64xf32, #tpu.memory_space<vmem>>, vector<1x16x64xf32>
    %3 = vector.shape_cast %2 : vector<1x16x64xf32> to vector<16x64xf32>
    %c1 = arith.constant 1 : index
    %c4 = arith.constant 4 : index
    %4 = vector.load %arg5[%c1, %c4] : memref<18x72xf32, #tpu.memory_space<vmem>>, vector<16x64xf32>
    tpu.vector_store %arg5[%c1, %c4], %3 {strides = array<i32>} : memref<18x72xf32, #tpu.memory_space<vmem>>, vector<16x64xf32>,
    %c216 = arith.constant 216 : index
    %c0_4 = arith.constant 0 : index
    %5 = vector.load %arg2[%c216, %c0_4] : memref<224x64xf32, #tpu.memory_space<vmem>>, vector<1x64xf32>
    %6 = vector.shape_cast %5 : vector<1x64xf32> to vector<1x64xf32>
    %7 = vector.broadcast %6 : vector<1x64xf32> to vector<16x64xf32>
    %c0_5 = arith.constant 0 : index
    %c0_6 = arith.constant 0 : index
    %8 = vector.load %arg5[%c0_5, %c0_6] : memref<18x72xf32, #tpu.memory_space<vmem>>, vector<16x72xf32>
    %c0_7 = arith.constant 0 : index
    %c0_8 = arith.constant 0 : index
    %9 = vector.load %arg2[%c0_7, %c0_8] : memref<224x64xf32, #tpu.memory_space<vmem>>, vector<72x64xf32>
    %cst_9 = arith.constant dense<0.000000e+00> : vector<16x64xf32>
    %10 = tpu.matmul %8, %9, %cst_9 {dimension_numbers = #tpu.dot_dimension_numbers<[1], [0], [0], [1], [0, 0, 1, 1], [], []>} : vector<16x72xf32>, vector<72x64xf32>, vector<16x64xf32> -> vector<16x64xf32>
    %11 = arith.addf %7, %10 : vector<16x64xf32>
    %c1_10 = arith.constant 1 : index
    %c0_11 = arith.constant 0 : index
    %12 = vector.load %arg5[%c1_10, %c0_11] : memref<18x72xf32, #tpu.memory_space<vmem>>, vector<16x72xf32>
    %c72 = arith.constant 72 : index
    %c0_12 = arith.constant 0 : index
    %13 = vector.load %arg2[%c72, %c0_12] : memref<224x64xf32, #tpu.memory_space<vmem>>, vector<72x64xf32>
    %cst_13 = arith.constant dense<0.000000e+00> : vector<16x64xf32>
    %14 = tpu.matmul %12, %13, %cst_13 {dimension_numbers = #tpu.dot_dimension_numbers<[1], [0], [0], [1], [0, 0, 1, 1], [], []>} : vector<16x72xf32>, vector<72x64xf32>, vector<16x64xf32> -> vector<16x64xf32>
    %15 = arith.addf %11, %14 : vector<16x64xf32>
    %c2 = arith.constant 2 : index
    %c0_14 = arith.constant 0 : index
    %16 = vector.load %arg5[%c2, %c0_14] : memref<18x72xf32, #tpu.memory_space<vmem>>, vector<16x72xf32>
    %c144 = arith.constant 144 : index
    %c0_15 = arith.constant 0 : index
    %17 = vector.load %arg2[%c144, %c0_15] : memref<224x64xf32, #tpu.memory_space<vmem>>, vector<72x64xf32>
    %cst_16 = arith.constant dense<0.000000e+00> : vector<16x64xf32>
    %18 = tpu.matmul %16, %17, %cst_16 {dimension_numbers = #tpu.dot_dimension_numbers<[1], [0], [0], [1], [0, 0, 1, 1], [], []>} : vector<16x72xf32>, vector<72x64xf32>, vector<16x64xf32> -> vector<16x64xf32>
    %19 = arith.addf %15, %18 : vector<16x64xf32>
    %cst_17 = arith.constant 0.000000e+00 : f32
    %20 = vector.broadcast %cst_17 : f32 to vector<16x64xf32>
    %21 = arith.cmpf oge, %19, %20 : vector<16x64xf32>
    %cst_18 = arith.constant 0.00999999977 : f32
    %22 = vector.broadcast %cst_18 : f32 to vector<16x64xf32>
    %23 = arith.mulf %22, %19 : vector<16x64xf32>
    %24 = arith.select %21, %19, %23 : vector<16x64xi1>, vector<16x64xf32>
    %c1_19 = arith.constant 1 : index
    %c4_20 = arith.constant 4 : index
    %25 = vector.load %arg5[%c1_19, %c4_20] : memref<18x72xf32, #tpu.memory_space<vmem>>, vector<16x64xf32>
    tpu.vector_store %arg5[%c1_19, %c4_20], %24 {strides = array<i32>} : memref<18x72xf32, #tpu.memory_space<vmem>>, vector<16x64xf32>,
    %c216_21 = arith.constant 216 : index
    %c0_22 = arith.constant 0 : index
    %26 = vector.load %arg3[%c216_21, %c0_22] : memref<224x64xf32, #tpu.memory_space<vmem>>, vector<1x64xf32>
    %27 = vector.shape_cast %26 : vector<1x64xf32> to vector<1x64xf32>
    %28 = vector.broadcast %27 : vector<1x64xf32> to vector<16x64xf32>
    %c0_23 = arith.constant 0 : index
    %c0_24 = arith.constant 0 : index
    %29 = vector.load %arg5[%c0_23, %c0_24] : memref<18x72xf32, #tpu.memory_space<vmem>>, vector<16x72xf32>
    %c0_25 = arith.constant 0 : index
    %c0_26 = arith.constant 0 : index
    %30 = vector.load %arg3[%c0_25, %c0_26] : memref<224x64xf32, #tpu.memory_space<vmem>>, vector<72x64xf32>
    %cst_27 = arith.constant dense<0.000000e+00> : vector<16x64xf32>
    %31 = tpu.matmul %29, %30, %cst_27 {dimension_numbers = #tpu.dot_dimension_numbers<[1], [0], [0], [1], [0, 0, 1, 1], [], []>} : vector<16x72xf32>, vector<72x64xf32>, vector<16x64xf32> -> vector<16x64xf32>
    %32 = arith.addf %28, %31 : vector<16x64xf32>
    %c1_28 = arith.constant 1 : index
    %c0_29 = arith.constant 0 : index
    %33 = vector.load %arg5[%c1_28, %c0_29] : memref<18x72xf32, #tpu.memory_space<vmem>>, vector<16x72xf32>
    %c72_30 = arith.constant 72 : index
    %c0_31 = arith.constant 0 : index
    %34 = vector.load %arg3[%c72_30, %c0_31] : memref<224x64xf32, #tpu.memory_space<vmem>>, vector<72x64xf32>
    %cst_32 = arith.constant dense<0.000000e+00> : vector<16x64xf32>
    %35 = tpu.matmul %33, %34, %cst_32 {dimension_numbers = #tpu.dot_dimension_numbers<[1], [0], [0], [1], [0, 0, 1, 1], [], []>} : vector<16x72xf32>, vector<72x64xf32>, vector<16x64xf32> -> vector<16x64xf32>
    %36 = arith.addf %32, %35 : vector<16x64xf32>
    %c2_33 = arith.constant 2 : index
    %c0_34 = arith.constant 0 : index
    %37 = vector.load %arg5[%c2_33, %c0_34] : memref<18x72xf32, #tpu.memory_space<vmem>>, vector<16x72xf32>
    %c144_35 = arith.constant 144 : index
    %c0_36 = arith.constant 0 : index
    %38 = vector.load %arg3[%c144_35, %c0_36] : memref<224x64xf32, #tpu.memory_space<vmem>>, vector<72x64xf32>
    %cst_37 = arith.constant dense<0.000000e+00> : vector<16x64xf32>
    %39 = tpu.matmul %37, %38, %cst_37 {dimension_numbers = #tpu.dot_dimension_numbers<[1], [0], [0], [1], [0, 0, 1, 1], [], []>} : vector<16x72xf32>, vector<72x64xf32>, vector<16x64xf32> -> vector<16x64xf32>
    %40 = arith.addf %36, %39 : vector<16x64xf32>
    %c0_38 = arith.constant 0 : index
    %c0_39 = arith.constant 0 : index
    %c0_40 = arith.constant 0 : index
    %41 = vector.load %arg1[%c0_38, %c0_39, %c0_40] : memref<1x16x64xf32, #tpu.memory_space<vmem>>, vector<1x16x64xf32>
    %42 = vector.shape_cast %41 : vector<1x16x64xf32> to vector<16x64xf32>
    %43 = arith.addf %40, %42 : vector<16x64xf32>
    %cst_41 = arith.constant 0.000000e+00 : f32
    %44 = vector.broadcast %cst_41 : f32 to vector<16x64xf32>
    %45 = arith.cmpf oge, %43, %44 : vector<16x64xf32>
    %cst_42 = arith.constant 0.00999999977 : f32
    %46 = vector.broadcast %cst_42 : f32 to vector<16x64xf32>
    %47 = arith.mulf %46, %43 : vector<16x64xf32>
    %48 = arith.select %45, %43, %47 : vector<16x64xi1>, vector<16x64xf32>
    %c0_43 = arith.constant 0 : index
    %c0_44 = arith.constant 0 : index
    %c0_45 = arith.constant 0 : index
    %49 = vector.load %arg4[%c0_43, %c0_44, %c0_45] : memref<1x16x64xf32, #tpu.memory_space<vmem>>, vector<1x16x64xf32>
    %50 = vector.shape_cast %49 : vector<1x16x64xf32> to vector<16x64xf32>
    %51 = vector.shape_cast %48 : vector<16x64xf32> to vector<1x16x64xf32>
    tpu.vector_store %arg4[%c0_43, %c0_44, %c0_45], %51 {strides = array<i32>} : memref<1x16x64xf32, #tpu.memory_space<vmem>>, vector<1x16x64xf32>,
    return
  }
  func.func @transform_0(%arg0: i32) -> (i32, i32, i32) {
    %c0_i32 = arith.constant 0 : i32
    %c0_i32_0 = arith.constant 0 : i32
    %c0_i32_1 = arith.constant 0 : i32
    return %arg0, %c0_i32, %c0_i32_0 : i32, i32, i32
  }
  func.func @transform_1(%arg0: i32) -> (i32, i32) {
    %c0_i32 = arith.constant 0 : i32
    %c0_i32_0 = arith.constant 0 : i32
    %c0_i32_1 = arith.constant 0 : i32
    return %c0_i32, %c0_i32_0 : i32, i32
  }
  func.func @transform_2(%arg0: i32) -> (i32, i32) {
    %c0_i32 = arith.constant 0 : i32
    %c0_i32_0 = arith.constant 0 : i32
    %c0_i32_1 = arith.constant 0 : i32
    return %c0_i32, %c0_i32_0 : i32, i32
  }
  func.func @transform_3(%arg0: i32) -> (i32, i32, i32) {
    %c0_i32 = arith.constant 0 : i32
    %c0_i32_0 = arith.constant 0 : i32
    %c0_i32_1 = arith.constant 0 : i32
    return %arg0, %c0_i32, %c0_i32_0 : i32, i32, i32
  }
}

</mosaic_0001>

<bundles_post_ra>
// kernel: tpu_custom_call.1
= control target key start
LH: loop header
LB: loop body
LE: loop exit
PB: predicated region body
PF: predicated region fallthrough
CT: control target
= control target key end

     0   :  { %8 = vsyncpa [#allocation4], 0  ;;  %s1627_s0 = inlined_call_operand.vmem [shape: f32[2,16,64], index: 0, kind: input, shape index: {}]   ;;  %s1628_s1 = inlined_call_operand.vmem [shape: f32[224,64], index: 1, kind: input, shape index: {}]   ;;  %s1629_s2 = inlined_call_operand.vmem [shape: f32[224,64], index: 2, kind: input, shape index: {}]   ;;  %s1630_s3 = inlined_call_operand.hbm [shape: f32[2,16,64], index: 3, kind: output, shape index: {}]  }
   0x1   :  { %10 = vsyncpa [#allocation4 + $0x1], 0  ;;  %s1326_s12 = smov 0   ;;  %s1328_s13 = smov 0  }
   0x2   :  { %s1330_s14 = smov 0   ;;  %s1332_s15 = smov 0  }
   0x3 LB: > { %s1347_s16 = sadd.s32 4294967295, %s1299_s15   ;;  %s866_s17 = sadd.s32 4294967294, %s1299_s15   ;;  %s1299_s15 = sphi %s1332_s15, %s1636_s15   ;;  %s1295_s14 = sphi %s1330_s14, %s1635_s14   ;;  %s1291_s13 = sphi %s1328_s13, %s1634_s13   ;;  %s1287_s12 = sphi %s1326_s12, %s1633_s12  }
   0x4   : > { %s1351_s18 = sadd.s32 1, %s1299_s15   ;;  %s91_s19 = sadd.s32 1, %s1295_s14 }
   0x5   : > { %s88_s20 = ssub.s32 %s1299_s15, %s1351_s18  ;;  %p101_p0 = scmp.ne.s32.totalorder %s1295_s14, %s1291_s13 }
   0x6   : > { %p89_p1 = scmp.eq.s32.totalorder %s88_s20, 0  ;;  %p102_p2 = scmp.eq.s32.totalorder %s1347_s16, 1 }
   0x7   : > { %p107_p3 = scmp.ne.s32.totalorder %s1291_s13, %s1287_s12  ;;  %p108_p4 = scmp.eq.s32.totalorder %s866_s17, 1 }
   0x8   : > { %s1362_s21 = scalar_select %p89_p1, %s1295_s14, %s91_s19  }
   0x9   : > { %p1364_p5 = por %p102_p2, %p101_p0  ;;  %p1368_p6 = por %p108_p4, %p107_p3 }
   0xa   : > { %p869_p7 = scmp.ge.s32.totalorder %s1299_s15, 1  ;;  %p140_p8 = scmp.lt.s32.totalorder %s1299_s15, 3 }
   0xc   : > { %p141_p9 = pnand %p869_p7, %p140_p8 }
   0xd   : > { %p164_p10 = scmp.lt.s32.totalorder (!%p141_p9), %s1347_s16, 1  ;;  %v194_v0 = vld [vmem:[%s1628_s1] sm:$0xff] (!%p141_p9)  ;;  %v195_v1 = vld [vmem:[%s1628_s1 + $0x8] sm:$0xff] (!%p141_p9)  ;;  %v196_v2 = vld [vmem:[%s1628_s1 + $0x10] sm:$0xff] (!%p141_p9)  ;;  %vm169_vm0 = vcmask (!%p141_p9), 588800   ;;  %vm172_vm1 = vcmask (!%p141_p9), 582656  }
   0xe   : > { %144 = sbr.rel (%p141_p9) target bundleno = 805 (0x325), region = 32  ;;  %v1086_v3 = vpack.c.bf16 (!%p141_p9), %v195_v1, %v194_v0  ;;  %v197_v4 = vld [vmem:[%s1628_s1 + $0x18] sm:$0xff] (!%p141_p9)  ;;  %v1301_v6 = vmov (!%p141_p9), 0.0   ;;  %v198_v7 = vld [vmem:[%s1628_s1 + $0x20] sm:$0xff] (!%p141_p9)  ;;  %v199_v8 = vld [vmem:[%s1628_s1 + $0x28] sm:$0xff] (!%p141_p9)  ;;  %s1302_s27 = smov (!%p141_p9), 4  }
   0xf   : > { %v1090_v5 = vpack.c.bf16 (!%p141_p9), %v197_v4, %v196_v2  ;;  %170 = vst.msk [vmem:[#allocation2] sm:$0xff] (!%p141_p9), %vm169_vm0, %v1301_v6  ;;  %171 = vst.msk [vmem:[#allocation2 + $0x8] sm:$0xff] (!%p141_p9), %vm169_vm0, %v1301_v6  ;;  %v1094_v9 = vpack.c.bf16 (!%p141_p9), %v199_v8, %v198_v7  ;;  %v200_v11 = vld [vmem:[%s1628_s1 + $0x30] sm:$0xff] (!%p141_p9)  ;;  %v201_v12 = vld [vmem:[%s1628_s1 + $0x38] sm:$0xff] (!%p141_p9)  ;;  %vm184_vm2 = vcmask (!%p141_p9), 556064   ;;  %s161_s8 = sand.u32 (!%p141_p9), 1, %s1291_s13  }
  0x10   : > { %173 = vst.msk [vmem:[#allocation2 + $0x10] sm:$0x3] (!%p141_p9), %vm172_vm1, %v1301_v6  ;;  %1087 = vmatprep.subr.bf16.mxu0 (!%p141_p9), %v1086_v3  ;;  %v1098_v14 = vpack.c.bf16 (!%p141_p9), %v201_v12, %v200_v11  ;;  %v202_v15 = vld [vmem:[%s1628_s1 + $0x40] sm:$0xff] (!%p141_p9)  ;;  %v288_v16 = vld [vmem:[%s1628_s1 + $0x48] sm:$0xff] (!%p141_p9)  ;;  %v289_v17 = vld [vmem:[%s1628_s1 + $0x50] sm:$0xff] (!%p141_p9)  ;;  %s870_s9 = sshll.u32 (!%p141_p9), %s161_s8, 4 }
  0x11   : > { %1089 = vmatpush3.bf16.msra.mxu0 (!%p141_p9), %v1086_v3  ;;  %v1102_v18 = vpack.c.bf16 (!%p141_p9), %v289_v17, %v288_v16  ;;  %v290_v22 = vld [vmem:[%s1628_s1 + $0x58] sm:$0xff] (!%p141_p9)  ;;  %v291_v23 = vld [vmem:[%s1628_s1 + $0x60] sm:$0xff] (!%p141_p9)  ;;  %v292_v26 = vld [vmem:[%s1628_s1 + $0x68] sm:$0xff] (!%p141_p9)  ;;  %s893_s17 = sshll.u32 (!%p141_p9), %s1347_s16, 8  ;;  %vm787_vm6 = vcmask (!%p141_p9), 523264   ;;  %s1303_s28 = smov (!%p141_p9), [#allocation3]  }
  0x12   : > { %1091 = vmatprep.subr.bf16.mxu0 (!%p141_p9), %v1090_v5  ;;  %v1106_v24 = vpack.c.bf16 (!%p141_p9), %v291_v23, %v290_v22  ;;  %v293_v27 = vld [vmem:[%s1628_s1 + $0x70] sm:$0xff] (!%p141_p9)  ;;  %v294_v30 = vld [vmem:[%s1628_s1 + $0x78] sm:$0xff] (!%p141_p9)  ;;  %v295_v31 = vld [vmem:[%s1628_s1 + $0x80] sm:$0xff] (!%p141_p9)  ;;  %s1582_s25 = scalar_lea.hbm (!%p141_p9), %s1630_s3, %s893_s17  ;;  %s1241_s29 = sshll.u32 (!%p141_p9), %s1303_s28, 4  ;;  %s1242_s29 = int_to_ptr.vmem [resolvable:$false] %s1241_s29 }
  0x13   : > { %v1110_v29 = vpack.c.bf16 (!%p141_p9), %v293_v27, %v292_v26  ;;  %v1114_v32 = vpack.c.bf16 (!%p141_p9), %v295_v31, %v294_v30  ;;  %v296_v33 = vld [vmem:[%s1628_s1 + $0x88] sm:$0xff] (!%p141_p9)  ;;  %v382_v34 = vld [vmem:[%s1628_s1 + $0x90] sm:$0xff] (!%p141_p9)  ;;  %v383_v35 = vld [vmem:[%s1628_s1 + $0x98] sm:$0xff] (!%p141_p9)  ;;  %s1243_s30 = scalar_lea.vmem (!%p141_p9), %s1242_s29, 512 }
  0x14   : > { %v384_v36 = vld [vmem:[%s1628_s1 + $0xa0] sm:$0xff] (!%p141_p9)  ;;  %v385_v37 = vld [vmem:[%s1628_s1 + $0xa8] sm:$0xff] (!%p141_p9)  ;;  %v1118_v38 = vpack.c.bf16 (!%p141_p9), %v383_v35, %v382_v34  ;;  %v386_v41 = vld [vmem:[%s1628_s1 + $0xb0] sm:$0xff] (!%p141_p9) }
  0x15   : > { %s165_s5 = scalar_select %p164_p10, %s1347_s16, 1  ;;  %1093 = vmatpush3.bf16.msra.mxu0 %v1090_v5  ;;  %v1122_v39 = vpack.c.bf16 %v385_v37, %v384_v36  ;;  %v387_v42 = vld [vmem:[%s1628_s1 + $0xb8] sm:$0xff]  ;;  %v388_v45 = vld [vmem:[%s1628_s1 + $0xc0] sm:$0xff]  ;;  %v389_v46 = vld [vmem:[%s1628_s1 + $0xc8] sm:$0xff] }
  0x16   : > { %1095 = vmatprep.subr.bf16.mxu0 %v1094_v9  ;;  %v1126_v44 = vpack.c.bf16 %v387_v42, %v386_v41  ;;  %v1130_v47 = vpack.c.bf16 %v389_v46, %v388_v45  ;;  %v390_v48 = vld [vmem:[%s1628_s1 + $0xd0] sm:$0xff]  ;;  %v497_v50 = vld [vmem:[%s1629_s2] sm:$0xff]  ;;  %v498_v51 = vld [vmem:[%s1629_s2 + $0x8] sm:$0xff]  ;;  %s1586_s16 = scalar_lea.sflag [#allocation4], %s161_s8 }
  0x17   : > { %s892_s10 = sshll.u32 %s165_s5, 4  ;;  %v499_v52 = vld [vmem:[%s1629_s2 + $0x10] sm:$0xff]  ;;  %v1134_v53 = vpack.c.bf16 %v498_v51, %v497_v50  ;;  %v500_v54 = vld [vmem:[%s1629_s2 + $0x18] sm:$0xff]  ;;  %v501_v56 = vld [vmem:[%s1629_s2 + $0x20] sm:$0xff] }
  0x18   : > { %s168_s19 = scalar_lea.vmem %s1627_s0, %s892_s10  ;;  %v1138_v55 = vpack.c.bf16 %v500_v54, %v499_v52  ;;  %v502_v57 = vld [vmem:[%s1629_s2 + $0x28] sm:$0xff]  ;;  %v503_v59 = vld [vmem:[%s1629_s2 + $0x30] sm:$0xff]  ;;  %v504_v60 = vld [vmem:[%s1629_s2 + $0x38] sm:$0xff] }
  0x19   : > { %v1399_v10 = vld [vmem:[%s168_s19] sm:$0xff]  ;;  %v1409_v13 = vld [vmem:[%s168_s19 + $0x8] sm:$0xff]  ;;  %1097 = vmatpush3.bf16.msra.mxu0 %v1094_v9  ;;  %1135 = vmatprep.subr.bf16.mxu1 %v1134_v53  ;;  %v1142_v58 = vpack.c.bf16 %v502_v57, %v501_v56  ;;  %v1146_v61 = vpack.c.bf16 %v504_v60, %v503_v59  ;;  %v873_v62 = vld [vmem:[%s1628_s1 + $0xd8] ss:$0 sm:$0xff]  ;;  %s163_s19 = scalar_lea.vmem [#allocation3], %s870_s9 }
  0x1a   : > { %178 = vrot.lane.b32.xlu0 %v1399_v10, %s1302_s27  ;;  %1099 = vmatprep.subr.bf16.mxu0 %v1098_v14  ;;  %v505_v3 = vld [vmem:[%s1629_s2 + $0x40] sm:$0xff]  ;;  %v591_v4 = vld [vmem:[%s1629_s2 + $0x48] sm:$0xff]  ;;  %v592_v5 = vld [vmem:[%s1629_s2 + $0x50] sm:$0xff]  ;;  %s804_s20 = sshll.u32 %s163_s19, 4  ;;  %s1584_s20 = int_to_ptr.vmem [resolvable:$true] %s804_s20 }
  0x1b   : > { %1137 = vmatpush3.bf16.msra.mxu1 %v1134_v53  ;;  %v1150_v6 = vpack.c.bf16 %v592_v5, %v591_v4  ;;  %v593_v16 = vld [vmem:[%s1629_s2 + $0x58] sm:$0xff]  ;;  %v594_v17 = vld [vmem:[%s1629_s2 + $0x60] sm:$0xff]  ;;  %v599_v27 = vld [vmem:[%s1629_s2 + $0x88] sm:$0xff]  ;;  %s1237_s26 = scalar_lea.vmem %s1584_s20, 256  ;;  %p1244_p0 = scmp.lt.s32.totalorder %s1584_s20, %s1242_s29 }
  0x1c   : > { %1139 = vmatprep.subr.bf16.mxu1 %v1138_v55  ;;  %v687_v30 = vld [vmem:[%s1629_s2 + $0xa0] sm:$0xff]  ;;  %v688_v31 = vld [vmem:[%s1629_s2 + $0xa8] sm:$0xff]  ;;  %v689_v35 = vld [vmem:[%s1629_s2 + $0xb0] sm:$0xff]  ;;  %p1238_p11 = scmp.ne.s32.totalorder %s1584_s20, %s1237_s26  ;;  %p1245_p1 = scmp.lt.s32.totalorder %s1243_s30, %s1237_s26 }
  0x1d   : > { %1101 = vmatpush3.bf16.msra.mxu0 %v1098_v14  ;;  %v690_v36 = vld [vmem:[%s1629_s2 + $0xb8] sm:$0xff]  ;;  %v693_v42 = vld [vmem:[%s1629_s2 + $0xd0] sm:$0xff] }
  0x1e   : > { %180 = vrot.lane.b32.xlu0 %v1409_v13, %s1302_s27  ;;  %976 = vmatprep.subr.mxu0 %v202_v15  ;;  %p1239_p12 = pnand %p1238_p11, %p1364_p5  ;;  %p1246_p2 = por %p1245_p1, %p1244_p0 }
  0x1f   : > { %1141 = vmatpush3.bf16.msra.mxu1 %v1138_v55 }
  0x20   : > { %1143 = vmatprep.subr.bf16.mxu1 %v1142_v58  ;;  %p1240_p13 = pneg %p1239_p12 }
  0x21   : > { %977 = vmatpush3.msra.mxu0 %v202_v15 }
  0x22   : > { %1103 = vmatprep.subr.bf16.mxu0 %v1102_v18  ;;  %p1247_p3 = pnand %p1246_p2, %p1240_p13 }
  0x23   : > { %1145 = vmatpush3.bf16.msra.mxu1 %v1142_v58 }
  0x24   : > { %1147 = vmatprep.subr.bf16.mxu1 %v1146_v61 }
  0x27   : > { %1149 = vmatpush3.bf16.msra.mxu1 %v1146_v61 }
  0x28   : > { %1039 = vmatprep.subr.mxu1 %v505_v3 }
  0x2b   : > { %1040 = vmatpush3.msra.mxu1 %v505_v3 }
  0x2c   : > { %1151 = vmatprep.subr.bf16.mxu1 %v1150_v6 }
  0x8c   : > { %v179_v19 = vpop.permute.xlu0 %178 }
  0x8d   : > { %185 = vst.msk [vmem:[#allocation2 + $0x1] sm:$0xff] %vm184_vm2, %v179_v19 }
  0x90   : > { %v181_v20 = vpop.permute.xlu0 %180 }
  0x91   : > { %186 = vst.msk [vmem:[#allocation2 + $0x9] sm:$0xff] %vm184_vm2, %v181_v20  ;;  %v595_v20 = vld [vmem:[%s1629_s2 + $0x68] sm:$0xff] }
  0x94   : > { %v192_v21 = vld [vmem:[#allocation2] sm:$0xff] }
  0x95   : > { %978 = vmatprep.mubr.msk.f32.mxu0 %vm169_vm0, %v192_v21  ;;  %v286_v28 = vld [vmem:[#allocation2 + $0x1] sm:$0xff]  ;;  %v596_v21 = vld [vmem:[%s1629_s2 + $0x70] sm:$0xff] }
  0x96   : > { %v1158_v23 = vpack.c.bf16 %v596_v21, %v595_v20 }
  0x98   : > { %v193_v25 = vld [vmem:[#allocation2 + $0x8] sm:$0xff] }
  0x99   : > { %979 = vmatmul.mubr.msk.f32.vlgmr.msra.gmra.mrb[0].mxu0 %vm169_vm0, %v193_v25  ;;  %v287_v40 = vld [vmem:[#allocation2 + $0x9] sm:$0xff]  ;;  %v598_v25 = vld [vmem:[%s1629_s2 + $0x80] sm:$0xff] }
  0x9a   : > { %1105 = vmatpush3.bf16.msra.mxu0 %v1102_v18  ;;  %999 = vmatprep.mubr.msk.f32.mxu0 %vm169_vm0, %v286_v28  ;;  %v380_v43 = vld [vmem:[#allocation2 + $0x2] sm:$0xff]  ;;  %v381_v49 = vld [vmem:[#allocation2 + $0xa] sm:$0xff]  ;;  %v1154_v18 = vpack.c.bf16 %v594_v17, %v593_v16 }
  0x9b   : > { %1107 = vmatprep.subr.bf16.mxu0 %v1106_v24  ;;  %v685_v28 = vld [vmem:[%s1629_s2 + $0x90] sm:$0xff] }
  0x9e   : > { %1109 = vmatpush3.bf16.msra.mxu0 %v1106_v24  ;;  %v597_v24 = vld [vmem:[%s1629_s2 + $0x78] sm:$0xff] }
  0x9f   : > { %1111 = vmatprep.subr.bf16.mxu0 %v1110_v29  ;;  %v1162_v26 = vpack.c.bf16 %v598_v25, %v597_v24 }
  0xa2   : > { %1113 = vmatpush3.bf16.msra.mxu0 %v1110_v29  ;;  %v686_v29 = vld [vmem:[%s1629_s2 + $0x98] sm:$0xff] }
  0xa3   : > { %1115 = vmatprep.subr.bf16.mxu0 %v1114_v32 }
  0xa6   : > { %1117 = vmatpush3.bf16.msra.mxu0 %v1114_v32  ;;  %v1166_v32 = vpack.c.bf16 %v686_v29, %v685_v28 }
  0xa7   : > { %997 = vmatprep.subr.mxu0 %v296_v33 }
  0xaa   : > { %998 = vmatpush3.msra.mxu0 %v296_v33  ;;  %v1170_v33 = vpack.c.bf16 %v688_v31, %v687_v30 }
  0xab   : > { %1000 = vmatmul.mubr.msk.f32.vlgmr.msra.gmra.mrb[0].mxu0 %vm169_vm0, %v287_v40  ;;  %1119 = vmatprep.subr.bf16.mxu0 %v1118_v38  ;;  %v692_v40 = vld [vmem:[%s1629_s2 + $0xc8] sm:$0xff] }
  0xac   : > { %1121 = vmatpush3.bf16.msra.mxu0 %v1118_v38  ;;  %1020 = vmatprep.mubr.msk.f32.mxu0 %vm169_vm0, %v380_v43  ;;  %v1174_v38 = vpack.c.bf16 %v690_v36, %v689_v35 }
  0xad   : > { %1123 = vmatprep.subr.bf16.mxu0 %v1122_v39 }
  0xb0   : > { %1125 = vmatpush3.bf16.msra.mxu0 %v1122_v39  ;;  %v691_v39 = vld [vmem:[%s1629_s2 + $0xc0] sm:$0xff] }
  0xb1   : > { %1127 = vmatprep.subr.bf16.mxu0 %v1126_v44  ;;  %v1178_v41 = vpack.c.bf16 %v692_v40, %v691_v39 }
  0xb4   : > { %1129 = vmatpush3.bf16.msra.mxu0 %v1126_v44  ;;  %v880_v44 = vld [vmem:[%s1629_s2 + $0xd8] ss:$0 sm:$0xff] }
  0xb5   : > { %1131 = vmatprep.subr.bf16.mxu0 %v1130_v47 }
  0xb8   : > { %1133 = vmatpush3.bf16.msra.mxu0 %v1130_v47 }
  0xb9   : > { %1018 = vmatprep.subr.mxu0 %v390_v48 }
  0xbc   : > { %1019 = vmatpush3.msra.mxu0 %v390_v48 }
  0xbd   : > { %1021 = vmatmul.mubr.msk.f32.vlgmr.msra.gmra.mrb[0].mxu0 %vm169_vm0, %v381_v49 }
 0x190   : > { %v1022_v63 = vpop.f32.mrb[0].mxu0 }
 0x191   : > { %v463_v0 = vpop.f32.mrb[1].mxu0  ;;  %v1182_v1 = vadd.f32 %v1022_v63, %v873_v62 }
 0x192   : > { %v1183_v2 = vadd.f32 %v873_v62, %v463_v0 }
 0x193   : > { %v477_v8 = vmul.f32 0.01, %v1182_v1  ;;  %vm475_vm4 = vcmp.ge.f32.partialorder %v1182_v1, 0.0 }
 0x194   : > { %vm474_vm3 = vcmp.ge.f32.partialorder %v1183_v2, 0.0  ;;  %v476_v7 = vmul.f32 0.01, %v1183_v2 }
 0x195   : > { %v479_v11 = vsel %vm475_vm4, %v1182_v1, %v477_v8 }
 0x196   : > { %v478_v9 = vsel %vm474_vm3, %v1183_v2, %v476_v7 }
 0x197   : > { %482 = vrot.lane.b32.xlu1 %v478_v9, %s1302_s27 }
 0x19b   : > { %484 = vrot.lane.b32.xlu1 %v479_v11, %s1302_s27 }
 0x209   : > { %v483_v12 = vpop.permute.xlu1 %482 }
 0x20a   : > { %488 = vst.msk [vmem:[#allocation2 + $0x1] sm:$0xff] %vm184_vm2, %v483_v12 }
 0x20d   : > { %v485_v14 = vpop.permute.xlu1 %484 }
 0x20e   : > { %489 = vst.msk [vmem:[#allocation2 + $0x9] sm:$0xff] %vm184_vm2, %v485_v14 }
 0x211   : > { %v495_v15 = vld [vmem:[#allocation2] sm:$0xff] }
 0x212   : > { %1041 = vmatprep.mubr.msk.f32.mxu1 %vm169_vm0, %v495_v15  ;;  %v589_v22 = vld [vmem:[#allocation2 + $0x1] sm:$0xff] }
 0x215   : > { %v496_v19 = vld [vmem:[#allocation2 + $0x8] sm:$0xff] }
 0x216   : > { %1042 = vmatmul.mubr.msk.f32.vlgmr.msra.gmra.mrb[0].mxu1 %vm169_vm0, %v496_v19  ;;  %v590_v34 = vld [vmem:[#allocation2 + $0x9] sm:$0xff] }
 0x217   : > { %1153 = vmatpush3.bf16.msra.mxu1 %v1150_v6  ;;  %1062 = vmatprep.mubr.msk.f32.mxu1 %vm169_vm0, %v589_v22  ;;  %v683_v37 = vld [vmem:[#allocation2 + $0x2] sm:$0xff]  ;;  %v684_v43 = vld [vmem:[#allocation2 + $0xa] sm:$0xff] }
 0x218   : > { %1155 = vmatprep.subr.bf16.mxu1 %v1154_v18 }
 0x21b   : > { %1157 = vmatpush3.bf16.msra.mxu1 %v1154_v18 }
 0x21c   : > { %1159 = vmatprep.subr.bf16.mxu1 %v1158_v23 }
 0x21f   : > { %1161 = vmatpush3.bf16.msra.mxu1 %v1158_v23 }
 0x220   : > { %1163 = vmatprep.subr.bf16.mxu1 %v1162_v26 }
 0x223   : > { %1165 = vmatpush3.bf16.msra.mxu1 %v1162_v26 }
 0x224   : > { %1060 = vmatprep.subr.mxu1 %v599_v27 }
 0x227   : > { %1061 = vmatpush3.msra.mxu1 %v599_v27 }
 0x228   : > { %1063 = vmatmul.mubr.msk.f32.vlgmr.msra.gmra.mrb[0].mxu1 %vm169_vm0, %v590_v34  ;;  %1167 = vmatprep.subr.bf16.mxu1 %v1166_v32 }
 0x229   : > { %1169 = vmatpush3.bf16.msra.mxu1 %v1166_v32  ;;  %1083 = vmatprep.mubr.msk.f32.mxu1 %vm169_vm0, %v683_v37 }
 0x22a   : > { %1171 = vmatprep.subr.bf16.mxu1 %v1170_v33 }
 0x22d   : > { %1173 = vmatpush3.bf16.msra.mxu1 %v1170_v33 }
 0x22e   : > { %1175 = vmatprep.subr.bf16.mxu1 %v1174_v38 }
 0x231   : > { %1177 = vmatpush3.bf16.msra.mxu1 %v1174_v38 }
 0x232   : > { %1179 = vmatprep.subr.bf16.mxu1 %v1178_v41 }
 0x235   : > { %1181 = vmatpush3.bf16.msra.mxu1 %v1178_v41 }
 0x236   : > { %1081 = vmatprep.subr.mxu1 %v693_v42 }
 0x239   : > { %1082 = vmatpush3.msra.mxu1 %v693_v42 }
 0x23a   : > { %1084 = vmatmul.mubr.msk.f32.vlgmr.msra.gmra.mrb[0].mxu1 %vm169_vm0, %v684_v43 }
 0x30d   : > { %v1085_v45 = vpop.f32.mrb[0].mxu1 }
 0x30e   : > { %v1184_v46 = vadd.f32 %v1085_v45, %v880_v44  ;;  %v766_v47 = vpop.f32.mrb[1].mxu1 }
 0x30f   : > { %v1185_v48 = vadd.f32 %v880_v44, %v766_v47 }
 0x310   : > { %v780_v49 = vadd.f32 %v1184_v46, %v1409_v13 }
 0x311   : > { %v779_v50 = vadd.f32 %v1185_v48, %v1399_v10 }
 0x312   : > { %vm782_vm5 = vcmp.ge.f32.partialorder %v780_v49, 0.0  ;;  %v784_v51 = vmul.f32 0.01, %v780_v49 }
 0x313   : > { %vm781_vm7 = vcmp.ge.f32.partialorder %v779_v50, 0.0  ;;  %v783_v52 = vmul.f32 0.01, %v779_v50 }
 0x314   : > { %v786_v13 = vsel %vm782_vm5, %v780_v49, %v784_v51 }
 0x315   : > { %789 = vst.msk [vmem:[%s163_s19 + $0x8] sm:$0xff] %vm787_vm6, %v786_v13  ;;  %v785_v53 = vsel %vm781_vm7, %v779_v50, %v783_v52 }
 0x316   : > { %788 = vst.msk [vmem:[%s163_s19] sm:$0xff] %vm787_vm6, %v785_v53 }
 0x317   : > { %1250 = shalt.err (!%p1247_p3)
}
 0x318   : > { %s1251_s4 = scalar_lea.hbm %s1582_s25, 256  ;;  %s1255_s7 = scalar_lea.hbm %s1630_s3, 512 }
 0x319   : > { %p1252_p4 = scmp.ne.s32.totalorder %s1582_s25, %s1251_s4  ;;  %p1256_p9 = scmp.lt.u32.totalorder %s1582_s25, %s1630_s3 }
 0x31a   : > { %p1257_p10 = scmp.lt.u32.totalorder %s1255_s7, %s1251_s4  ;;  %p1259_p12 = scmp.lt.u32.totalorder %s1251_s4, %s1582_s25 }
 0x31b   : > { %p1253_p7 = pnand %p1252_p4, %p1364_p5 }
 0x31c   : > { %p1258_p11 = por %p1257_p10, %p1256_p9 }
 0x31d   : > { %p1254_p8 = pneg %p1253_p7 }
 0x31e   : > { %p1260_p13 = por %p1259_p12, %p1258_p11 }
 0x320   : > { %p1261_p0 = pnand %p1260_p13, %p1254_p8 }
 0x322   : > { %1264 = shalt.err (!%p1261_p0)
}
 0x323   : > { %s1304_s10 = smov 128   ;;  %s1305_s11 = smov 8  }
 0x324   : > { %1194 = dma.vmem_to_hbm [thread:$0]  (%p1364_p5), %s1584_s20, 256, %s1582_s25, %s1586_s16, %s1304_s10, %s1304_s10, %s1305_s11  }
 0x325 PF: > { %p1200_p1 = scmp.ge.s32.totalorder %s1299_s15, 2  ;;  %s819_s17 = sand.u32 1, %s1287_s12  }
 0x326   : > { %s820_s19 = scalar_lea.sflag [#allocation4], %s819_s17 }
 0x327   : > { %p1197_p2 = pnand %p1200_p1, %p1368_p6 }
 0x329   : > { %1282 = dma.done.wait (!%p1197_p2), %s820_s19, 256  }
 0x32a   : > { %1284 = vsyncadd (!%p1197_p2), %s820_s19, 4294967040  ;;  %p13_p3 = scmp.ge.s32.totalorder %s1351_s18, 4   ;;  %s1633_s12 = smov %s1291_s13 }
 0x32b   : > { %s1634_s13 = smov %s1295_s14  ;;  %s1635_s14 = smov %s1362_s21 }
 0x32c   : > { %s1636_s15 = smov %s1351_s18  ;;  %15 = sbr.rel (!%p13_p3) target bundleno = 3 (0x3), region = 67 }
 0x333   :  { %825 = vsyncpa [#allocation4], 1 }
 0x334   :  { %827 = vsyncpa [#allocation4 + $0x1], 1 }

</bundles_post_ra>
